<compile_context>
chip_gen: v5e
topology: v5e:2x2
jax: 0.10.0
libtpu: 0.0.40
codegen_flags: <defaults>
</compile_context>

<pallas_src>
import jax
import jax.numpy as jnp
from jax import lax
from jax.experimental import pallas as pl
from jax.experimental.pallas import tpu as pltpu


def rnn_seq_kernel(cat_ref, x_ref, hid0_ref, w_cat_ref, w_in_ref, w_h_ref,
                   b1_ref, w2_ref, b2_ref, out_ref, hid_out_ref, s_ref):
    T, B, HO = s_ref.shape
    H = hid_out_ref.shape[1]
    O = out_ref.shape[2]

    # ---- Phase 1: h-independent projections, batched over all T*B rows. ----
    # Category is time-invariant: project once and fold the bias in.
    base = (jnp.dot(cat_ref[...], w_cat_ref[...],
                    preferred_element_type=jnp.float32)
            + b1_ref[...])                                    # [B, H+O]
    # One big matmul instead of T tiny ones (MXU fill: M=8 -> M=T*B).
    s_x = jnp.dot(x_ref[...], w_in_ref[...],
                  preferred_element_type=jnp.float32)         # [T*B, H+O]
    s_ref[...] = s_x.reshape(T, B, HO) + base                 # broadcast over T

    # ---- Phase 2: the true recurrence (only h @ w_h on the serial chain). ----
    w_h = w_h_ref[...]                                        # hoisted weight load

    def step(t, h):
        s1 = s_ref[t] + jnp.dot(h, w_h, preferred_element_type=jnp.float32)
        s_ref[t] = s1                # stash [hidden | output] slab for deferred o2o
        return s1[:, :H]             # new hidden stays vreg-resident (carry)

    h_final = lax.fori_loop(0, T, step, hid0_ref[...], unroll=True)
    hid_out_ref[...] = h_final.astype(hid_out_ref.dtype)

    # ---- Phase 3: deferred o2o projection + one batched log-softmax. ----
    # s_ref columns are exactly concat(hidden, output) -> o2o is one matmul.
    s_all = s_ref[...].reshape(T * B, HO)
    out2 = (jnp.dot(s_all, w2_ref[...], preferred_element_type=jnp.float32)
            + b2_ref[...])                                    # [T*B, O]

    # TODO(synk): nn.Dropout(0.1) is identity in eval mode; training-mode random
    # mask (pltpu.prng_seed + prng_random_bits) not applied.

    # LogSoftmax over the feature axis (numerically stable, max-shifted).
    m = jnp.max(out2, axis=-1, keepdims=True)
    shifted = out2 - m
    lse = jnp.log(jnp.sum(jnp.exp(shifted), axis=-1, keepdims=True))
    out_ref[...] = (shifted - lse).reshape(T, B, O).astype(out_ref.dtype)


def rnn_forward_seq(category, inputs, hidden0, params):
    """Run T timesteps of the RNN in one (grid-less) pallas_call.

    category: [B, n_cat]   (constant across the sequence, as in char-gen)
    inputs:   [T, B, input_size]
    hidden0:  [B, H]
    Returns (log_probs [T, B, O], final_hidden [B, H]).
    """
    (w_i2h, b_i2h, w_i2o, b_i2o, w_o2o, b_o2o) = params

    T, B, input_size = inputs.shape
    n_cat = category.shape[1]
    H = w_i2h.shape[1]
    O = w_i2o.shape[1]

    # --- host-side packing -------------------------------------------------
    # Stack i2h / i2o into one weight whose column order is [hidden | output],
    # then split its rows by the concat(category, input, hidden) operand order.
    w1 = jnp.concatenate([w_i2h, w_i2o], axis=1)           # [n_cat+in+H, H+O]
    w_cat = w1[:n_cat]                                      # rows for category
    w_in = w1[n_cat:n_cat + input_size]                     # rows for input_t
    w_h = w1[n_cat + input_size:]                           # rows for hidden (recurrent)
    b1 = jnp.concatenate([b_i2h, b_i2o], axis=1)            # [1, H+O]
    w2 = w_o2o                                              # [H+O, O] (rows = [hidden|output])
    b2 = b_o2o                                              # [1, O]

    x2d = inputs.reshape(T * B, input_size)                 # single input slab

    flops = 2 * (B * n_cat * (H + O)
                 + T * B * input_size * (H + O)
                 + T * B * H * (H + O)
                 + T * B * (H + O) * O)
    transcendentals = T * B * (O + 1)                       # exp over logits + log of sum
    bytes_accessed = 4 * (category.size + x2d.size + hidden0.size + w_cat.size
                          + w_in.size + w_h.size + b1.size + w2.size + b2.size
                          + T * B * O + B * H)

    out_shape = (
        jax.ShapeDtypeStruct((T, B, O), jnp.float32),       # per-step log-probs
        jax.ShapeDtypeStruct((B, H), jnp.float32),          # final hidden
    )

    return pl.pallas_call(
        rnn_seq_kernel,
        out_shape=out_shape,
        scratch_shapes=[pltpu.VMEM((T, B, H + O), jnp.float32)],  # s1 slab
        cost_estimate=pl.CostEstimate(
            flops=flops,
            transcendentals=transcendentals,
            bytes_accessed=bytes_accessed,
        ),
    )(category, x2d, hidden0, w_cat, w_in, w_h, b1, w2, b2)


def init_params(key, n_categories, input_size, hidden_size, output_size):
    """Deterministic PyTorch-Linear-style init. Weights stored transposed: [in, out]."""
    ks = jax.random.split(key, 6)

    def u(k, shape, fan_in):
        bound = 1.0 / jnp.sqrt(fan_in)
        return jax.random.uniform(k, shape, jnp.float32, -bound, bound)

    fan1 = n_categories + input_size + hidden_size
    fan2 = hidden_size + output_size

    w_i2h = u(ks[0], (fan1, hidden_size), fan1)
    b_i2h = u(ks[1], (1, hidden_size), fan1)
    w_i2o = u(ks[2], (fan1, output_size), fan1)
    b_i2o = u(ks[3], (1, output_size), fan1)
    w_o2o = u(ks[4], (fan2, output_size), fan2)
    b_o2o = u(ks[5], (1, output_size), fan2)
    return (w_i2h, b_i2h, w_i2o, b_i2o, w_o2o, b_o2o)


def rnn_forward_ref(category, inputs, hidden0, params):
    """Plain-JAX reference: the original per-step module applied over the sequence."""
    (w_i2h, b_i2h, w_i2o, b_i2o, w_o2o, b_o2o) = params

    def step(h, x_t):
        comb = jnp.concatenate([category, x_t, h], axis=1)
        new_h = comb @ w_i2h + b_i2h
        out1 = comb @ w_i2o + b_i2o
        out2 = jnp.concatenate([new_h, out1], axis=1) @ w_o2o + b_o2o
        # dropout(0.1) == identity in eval mode
        return new_h, jax.nn.log_softmax(out2, axis=1)

    hT, outs = jax.lax.scan(step, hidden0, inputs)
    return outs, hT


if __name__ == "__main__":
    n_categories = 8
    input_size = 16
    hidden_size = 32
    output_size = 16
    batch = 8        # fill the f32 8-sublane vreg height
    seq_len = 12     # whole generation loop in one kernel launch

    key = jax.random.PRNGKey(0)
    k_cat, k_inp, k_par = jax.random.split(key, 3)

    # one-hot-ish category (fixed per sequence) / per-step one-hot inputs
    category = jax.nn.one_hot(
        jax.random.randint(k_cat, (batch,), 0, n_categories), n_categories
    ).astype(jnp.float32)
    inputs = jax.nn.one_hot(
        jax.random.randint(k_inp, (seq_len, batch), 0, input_size), input_size
    ).astype(jnp.float32)
    hidden0 = jnp.zeros((batch, hidden_size), jnp.float32)  # initHidden()

    params = init_params(k_par, n_categories, input_size, hidden_size, output_size)

    outs, hT = rnn_forward_seq(category, inputs, hidden0, params)
    jax.block_until_ready((outs, hT))

    outs_ref, hT_ref = rnn_forward_ref(category, inputs, hidden0, params)
    assert jnp.allclose(outs, outs_ref, atol=1e-5), "output mismatch"
    assert jnp.allclose(hT, hT_ref, atol=1e-5), "hidden mismatch"

    print("KERNEL_OK")
</pallas_src>

<mosaic_0001>
module attributes {stable_mosaic.version = 11 : i64} {
  func.func @rnn_seq_kernel(%arg0: memref<8x8xf32, #tpu.memory_space<vmem>>, %arg1: memref<96x16xf32, #tpu.memory_space<vmem>>, %arg2: memref<8x32xf32, #tpu.memory_space<vmem>>, %arg3: memref<8x48xf32, #tpu.memory_space<vmem>>, %arg4: memref<16x48xf32, #tpu.memory_space<vmem>>, %arg5: memref<32x48xf32, #tpu.memory_space<vmem>>, %arg6: memref<1x48xf32, #tpu.memory_space<vmem>>, %arg7: memref<48x16xf32, #tpu.memory_space<vmem>>, %arg8: memref<1x16xf32, #tpu.memory_space<vmem>>, %arg9: memref<12x8x16xf32, #tpu.memory_space<vmem>>, %arg10: memref<8x32xf32, #tpu.memory_space<vmem>>, %arg11: memref<12x8x48xf32, #tpu.memory_space<vmem>>) attributes {dimension_semantics = [], scalar_prefetch = 0 : i64, scratch_operands = 1 : i64, tpu.core_type = #tpu.core_type<tc>} {
    %c0 = arith.constant 0 : index
    %c0_0 = arith.constant 0 : index
    %0 = vector.load %arg0[%c0, %c0_0] : memref<8x8xf32, #tpu.memory_space<vmem>>, vector<8x8xf32>
    %c0_1 = arith.constant 0 : index
    %c0_2 = arith.constant 0 : index
    %1 = vector.load %arg3[%c0_1, %c0_2] : memref<8x48xf32, #tpu.memory_space<vmem>>, vector<8x48xf32>
    %cst = arith.constant dense<0.000000e+00> : vector<8x48xf32>
    %2 = tpu.matmul %0, %1, %cst {dimension_numbers = #tpu.dot_dimension_numbers<[1], [0], [0], [1], [0, 0, 1, 1], [], []>} : vector<8x8xf32>, vector<8x48xf32>, vector<8x48xf32> -> vector<8x48xf32>
    %c0_3 = arith.constant 0 : index
    %c0_4 = arith.constant 0 : index
    %3 = vector.load %arg6[%c0_3, %c0_4] : memref<1x48xf32, #tpu.memory_space<vmem>>, vector<1x48xf32>
    %4 = vector.broadcast %3 : vector<1x48xf32> to vector<8x48xf32>
    %5 = arith.addf %2, %4 : vector<8x48xf32>
    %c0_5 = arith.constant 0 : index
    %c0_6 = arith.constant 0 : index
    %6 = vector.load %arg1[%c0_5, %c0_6] : memref<96x16xf32, #tpu.memory_space<vmem>>, vector<96x16xf32>
    %c0_7 = arith.constant 0 : index
    %c0_8 = arith.constant 0 : index
    %7 = vector.load %arg4[%c0_7, %c0_8] : memref<16x48xf32, #tpu.memory_space<vmem>>, vector<16x48xf32>
    %cst_9 = arith.constant dense<0.000000e+00> : vector<96x48xf32>
    %8 = tpu.matmul %6, %7, %cst_9 {dimension_numbers = #tpu.dot_dimension_numbers<[1], [0], [0], [1], [0, 0, 1, 1], [], []>} : vector<96x16xf32>, vector<16x48xf32>, vector<96x48xf32> -> vector<96x48xf32>
    %9 = vector.shape_cast %8 : vector<96x48xf32> to vector<12x8x48xf32>
    %10 = vector.shape_cast %5 : vector<8x48xf32> to vector<1x8x48xf32>
    %11 = vector.broadcast %10 : vector<1x8x48xf32> to vector<12x8x48xf32>
    %12 = arith.addf %9, %11 : vector<12x8x48xf32>
    %c0_10 = arith.constant 0 : index
    %c0_11 = arith.constant 0 : index
    %c0_12 = arith.constant 0 : index
    %13 = vector.load %arg11[%c0_10, %c0_11, %c0_12] : memref<12x8x48xf32, #tpu.memory_space<vmem>>, vector<12x8x48xf32>
    tpu.vector_store %arg11[%c0_10, %c0_11, %c0_12], %12 {strides = array<i32>} : memref<12x8x48xf32, #tpu.memory_space<vmem>>, vector<12x8x48xf32>,
    %c0_13 = arith.constant 0 : index
    %c0_14 = arith.constant 0 : index
    %14 = vector.load %arg5[%c0_13, %c0_14] : memref<32x48xf32, #tpu.memory_space<vmem>>, vector<32x48xf32>
    %c0_15 = arith.constant 0 : index
    %c0_16 = arith.constant 0 : index
    %15 = vector.load %arg2[%c0_15, %c0_16] : memref<8x32xf32, #tpu.memory_space<vmem>>, vector<8x32xf32>
    %c0_i32 = arith.constant 0 : i32
    %16 = arith.index_cast %c0_i32 : i32 to index
    %c0_17 = arith.constant 0 : index
    %c0_18 = arith.constant 0 : index
    %17 = vector.load %arg11[%16, %c0_17, %c0_18] : memref<12x8x48xf32, #tpu.memory_space<vmem>>, vector<1x8x48xf32>
    %18 = vector.shape_cast %17 : vector<1x8x48xf32> to vector<8x48xf32>
    %cst_19 = arith.constant dense<0.000000e+00> : vector<8x48xf32>
    %19 = tpu.matmul %15, %14, %cst_19 {dimension_numbers = #tpu.dot_dimension_numbers<[1], [0], [0], [1], [0, 0, 1, 1], [], []>} : vector<8x32xf32>, vector<32x48xf32>, vector<8x48xf32> -> vector<8x48xf32>
    %20 = arith.addf %18, %19 : vector<8x48xf32>
    %21 = arith.index_cast %c0_i32 : i32 to index
    %c0_20 = arith.constant 0 : index
    %c0_21 = arith.constant 0 : index
    %22 = vector.load %arg11[%21, %c0_20, %c0_21] : memref<12x8x48xf32, #tpu.memory_space<vmem>>, vector<1x8x48xf32>
    %23 = vector.shape_cast %22 : vector<1x8x48xf32> to vector<8x48xf32>
    %24 = vector.shape_cast %20 : vector<8x48xf32> to vector<1x8x48xf32>
    tpu.vector_store %arg11[%21, %c0_20, %c0_21], %24 {strides = array<i32>} : memref<12x8x48xf32, #tpu.memory_space<vmem>>, vector<1x8x48xf32>,
    %25 = vector.extract_strided_slice %20 {offsets = [0, 0], sizes = [8, 32], strides = [1, 1]} : vector<8x48xf32> to vector<8x32xf32>
    %c1_i32 = arith.constant 1 : i32
    %26 = arith.index_cast %c1_i32 : i32 to index
    %c0_22 = arith.constant 0 : index
    %c0_23 = arith.constant 0 : index
    %27 = vector.load %arg11[%26, %c0_22, %c0_23] : memref<12x8x48xf32, #tpu.memory_space<vmem>>, vector<1x8x48xf32>
    %28 = vector.shape_cast %27 : vector<1x8x48xf32> to vector<8x48xf32>
    %cst_24 = arith.constant dense<0.000000e+00> : vector<8x48xf32>
    %29 = tpu.matmul %25, %14, %cst_24 {dimension_numbers = #tpu.dot_dimension_numbers<[1], [0], [0], [1], [0, 0, 1, 1], [], []>} : vector<8x32xf32>, vector<32x48xf32>, vector<8x48xf32> -> vector<8x48xf32>
    %30 = arith.addf %28, %29 : vector<8x48xf32>
    %31 = arith.index_cast %c1_i32 : i32 to index
    %c0_25 = arith.constant 0 : index
    %c0_26 = arith.constant 0 : index
    %32 = vector.load %arg11[%31, %c0_25, %c0_26] : memref<12x8x48xf32, #tpu.memory_space<vmem>>, vector<1x8x48xf32>
    %33 = vector.shape_cast %32 : vector<1x8x48xf32> to vector<8x48xf32>
    %34 = vector.shape_cast %30 : vector<8x48xf32> to vector<1x8x48xf32>
    tpu.vector_store %arg11[%31, %c0_25, %c0_26], %34 {strides = array<i32>} : memref<12x8x48xf32, #tpu.memory_space<vmem>>, vector<1x8x48xf32>,
    %35 = vector.extract_strided_slice %30 {offsets = [0, 0], sizes = [8, 32], strides = [1, 1]} : vector<8x48xf32> to vector<8x32xf32>
    %c2_i32 = arith.constant 2 : i32
    %36 = arith.index_cast %c2_i32 : i32 to index
    %c0_27 = arith.constant 0 : index
    %c0_28 = arith.constant 0 : index
    %37 = vector.load %arg11[%36, %c0_27, %c0_28] : memref<12x8x48xf32, #tpu.memory_space<vmem>>, vector<1x8x48xf32>
    %38 = vector.shape_cast %37 : vector<1x8x48xf32> to vector<8x48xf32>
    %cst_29 = arith.constant dense<0.000000e+00> : vector<8x48xf32>
    %39 = tpu.matmul %35, %14, %cst_29 {dimension_numbers = #tpu.dot_dimension_numbers<[1], [0], [0], [1], [0, 0, 1, 1], [], []>} : vector<8x32xf32>, vector<32x48xf32>, vector<8x48xf32> -> vector<8x48xf32>
    %40 = arith.addf %38, %39 : vector<8x48xf32>
    %41 = arith.index_cast %c2_i32 : i32 to index
    %c0_30 = arith.constant 0 : index
    %c0_31 = arith.constant 0 : index
    %42 = vector.load %arg11[%41, %c0_30, %c0_31] : memref<12x8x48xf32, #tpu.memory_space<vmem>>, vector<1x8x48xf32>
    %43 = vector.shape_cast %42 : vector<1x8x48xf32> to vector<8x48xf32>
    %44 = vector.shape_cast %40 : vector<8x48xf32> to vector<1x8x48xf32>
    tpu.vector_store %arg11[%41, %c0_30, %c0_31], %44 {strides = array<i32>} : memref<12x8x48xf32, #tpu.memory_space<vmem>>, vector<1x8x48xf32>,
    %45 = vector.extract_strided_slice %40 {offsets = [0, 0], sizes = [8, 32], strides = [1, 1]} : vector<8x48xf32> to vector<8x32xf32>
    %c3_i32 = arith.constant 3 : i32
    %46 = arith.index_cast %c3_i32 : i32 to index
    %c0_32 = arith.constant 0 : index
    %c0_33 = arith.constant 0 : index
    %47 = vector.load %arg11[%46, %c0_32, %c0_33] : memref<12x8x48xf32, #tpu.memory_space<vmem>>, vector<1x8x48xf32>
    %48 = vector.shape_cast %47 : vector<1x8x48xf32> to vector<8x48xf32>
    %cst_34 = arith.constant dense<0.000000e+00> : vector<8x48xf32>
    %49 = tpu.matmul %45, %14, %cst_34 {dimension_numbers = #tpu.dot_dimension_numbers<[1], [0], [0], [1], [0, 0, 1, 1], [], []>} : vector<8x32xf32>, vector<32x48xf32>, vector<8x48xf32> -> vector<8x48xf32>
    %50 = arith.addf %48, %49 : vector<8x48xf32>
    %51 = arith.index_cast %c3_i32 : i32 to index
    %c0_35 = arith.constant 0 : index
    %c0_36 = arith.constant 0 : index
    %52 = vector.load %arg11[%51, %c0_35, %c0_36] : memref<12x8x48xf32, #tpu.memory_space<vmem>>, vector<1x8x48xf32>
    %53 = vector.shape_cast %52 : vector<1x8x48xf32> to vector<8x48xf32>
    %54 = vector.shape_cast %50 : vector<8x48xf32> to vector<1x8x48xf32>
    tpu.vector_store %arg11[%51, %c0_35, %c0_36], %54 {strides = array<i32>} : memref<12x8x48xf32, #tpu.memory_space<vmem>>, vector<1x8x48xf32>,
    %55 = vector.extract_strided_slice %50 {offsets = [0, 0], sizes = [8, 32], strides = [1, 1]} : vector<8x48xf32> to vector<8x32xf32>
    %c4_i32 = arith.constant 4 : i32
    %56 = arith.index_cast %c4_i32 : i32 to index
    %c0_37 = arith.constant 0 : index
    %c0_38 = arith.constant 0 : index
    %57 = vector.load %arg11[%56, %c0_37, %c0_38] : memref<12x8x48xf32, #tpu.memory_space<vmem>>, vector<1x8x48xf32>
    %58 = vector.shape_cast %57 : vector<1x8x48xf32> to vector<8x48xf32>
    %cst_39 = arith.constant dense<0.000000e+00> : vector<8x48xf32>
    %59 = tpu.matmul %55, %14, %cst_39 {dimension_numbers = #tpu.dot_dimension_numbers<[1], [0], [0], [1], [0, 0, 1, 1], [], []>} : vector<8x32xf32>, vector<32x48xf32>, vector<8x48xf32> -> vector<8x48xf32>
    %60 = arith.addf %58, %59 : vector<8x48xf32>
    %61 = arith.index_cast %c4_i32 : i32 to index
    %c0_40 = arith.constant 0 : index
    %c0_41 = arith.constant 0 : index
    %62 = vector.load %arg11[%61, %c0_40, %c0_41] : memref<12x8x48xf32, #tpu.memory_space<vmem>>, vector<1x8x48xf32>
    %63 = vector.shape_cast %62 : vector<1x8x48xf32> to vector<8x48xf32>
    %64 = vector.shape_cast %60 : vector<8x48xf32> to vector<1x8x48xf32>
    tpu.vector_store %arg11[%61, %c0_40, %c0_41], %64 {strides = array<i32>} : memref<12x8x48xf32, #tpu.memory_space<vmem>>, vector<1x8x48xf32>,
    %65 = vector.extract_strided_slice %60 {offsets = [0, 0], sizes = [8, 32], strides = [1, 1]} : vector<8x48xf32> to vector<8x32xf32>
    %c5_i32 = arith.constant 5 : i32
    %66 = arith.index_cast %c5_i32 : i32 to index
    %c0_42 = arith.constant 0 : index
    %c0_43 = arith.constant 0 : index
    %67 = vector.load %arg11[%66, %c0_42, %c0_43] : memref<12x8x48xf32, #tpu.memory_space<vmem>>, vector<1x8x48xf32>
    %68 = vector.shape_cast %67 : vector<1x8x48xf32> to vector<8x48xf32>
    %cst_44 = arith.constant dense<0.000000e+00> : vector<8x48xf32>
    %69 = tpu.matmul %65, %14, %cst_44 {dimension_numbers = #tpu.dot_dimension_numbers<[1], [0], [0], [1], [0, 0, 1, 1], [], []>} : vector<8x32xf32>, vector<32x48xf32>, vector<8x48xf32> -> vector<8x48xf32>
    %70 = arith.addf %68, %69 : vector<8x48xf32>
    %71 = arith.index_cast %c5_i32 : i32 to index
    %c0_45 = arith.constant 0 : index
    %c0_46 = arith.constant 0 : index
    %72 = vector.load %arg11[%71, %c0_45, %c0_46] : memref<12x8x48xf32, #tpu.memory_space<vmem>>, vector<1x8x48xf32>
    %73 = vector.shape_cast %72 : vector<1x8x48xf32> to vector<8x48xf32>
    %74 = vector.shape_cast %70 : vector<8x48xf32> to vector<1x8x48xf32>
    tpu.vector_store %arg11[%71, %c0_45, %c0_46], %74 {strides = array<i32>} : memref<12x8x48xf32, #tpu.memory_space<vmem>>, vector<1x8x48xf32>,
    %75 = vector.extract_strided_slice %70 {offsets = [0, 0], sizes = [8, 32], strides = [1, 1]} : vector<8x48xf32> to vector<8x32xf32>
    %c6_i32 = arith.constant 6 : i32
    %76 = arith.index_cast %c6_i32 : i32 to index
    %c0_47 = arith.constant 0 : index
    %c0_48 = arith.constant 0 : index
    %77 = vector.load %arg11[%76, %c0_47, %c0_48] : memref<12x8x48xf32, #tpu.memory_space<vmem>>, vector<1x8x48xf32>
    %78 = vector.shape_cast %77 : vector<1x8x48xf32> to vector<8x48xf32>
    %cst_49 = arith.constant dense<0.000000e+00> : vector<8x48xf32>
    %79 = tpu.matmul %75, %14, %cst_49 {dimension_numbers = #tpu.dot_dimension_numbers<[1], [0], [0], [1], [0, 0, 1, 1], [], []>} : vector<8x32xf32>, vector<32x48xf32>, vector<8x48xf32> -> vector<8x48xf32>
    %80 = arith.addf %78, %79 : vector<8x48xf32>
    %81 = arith.index_cast %c6_i32 : i32 to index
    %c0_50 = arith.constant 0 : index
    %c0_51 = arith.constant 0 : index
    %82 = vector.load %arg11[%81, %c0_50, %c0_51] : memref<12x8x48xf32, #tpu.memory_space<vmem>>, vector<1x8x48xf32>
    %83 = vector.shape_cast %82 : vector<1x8x48xf32> to vector<8x48xf32>
    %84 = vector.shape_cast %80 : vector<8x48xf32> to vector<1x8x48xf32>
    tpu.vector_store %arg11[%81, %c0_50, %c0_51], %84 {strides = array<i32>} : memref<12x8x48xf32, #tpu.memory_space<vmem>>, vector<1x8x48xf32>,
    %85 = vector.extract_strided_slice %80 {offsets = [0, 0], sizes = [8, 32], strides = [1, 1]} : vector<8x48xf32> to vector<8x32xf32>
    %c7_i32 = arith.constant 7 : i32
    %86 = arith.index_cast %c7_i32 : i32 to index
    %c0_52 = arith.constant 0 : index
    %c0_53 = arith.constant 0 : index
    %87 = vector.load %arg11[%86, %c0_52, %c0_53] : memref<12x8x48xf32, #tpu.memory_space<vmem>>, vector<1x8x48xf32>
    %88 = vector.shape_cast %87 : vector<1x8x48xf32> to vector<8x48xf32>
    %cst_54 = arith.constant dense<0.000000e+00> : vector<8x48xf32>
    %89 = tpu.matmul %85, %14, %cst_54 {dimension_numbers = #tpu.dot_dimension_numbers<[1], [0], [0], [1], [0, 0, 1, 1], [], []>} : vector<8x32xf32>, vector<32x48xf32>, vector<8x48xf32> -> vector<8x48xf32>
    %90 = arith.addf %88, %89 : vector<8x48xf32>
    %91 = arith.index_cast %c7_i32 : i32 to index
    %c0_55 = arith.constant 0 : index
    %c0_56 = arith.constant 0 : index
    %92 = vector.load %arg11[%91, %c0_55, %c0_56] : memref<12x8x48xf32, #tpu.memory_space<vmem>>, vector<1x8x48xf32>
    %93 = vector.shape_cast %92 : vector<1x8x48xf32> to vector<8x48xf32>
    %94 = vector.shape_cast %90 : vector<8x48xf32> to vector<1x8x48xf32>
    tpu.vector_store %arg11[%91, %c0_55, %c0_56], %94 {strides = array<i32>} : memref<12x8x48xf32, #tpu.memory_space<vmem>>, vector<1x8x48xf32>,
    %95 = vector.extract_strided_slice %90 {offsets = [0, 0], sizes = [8, 32], strides = [1, 1]} : vector<8x48xf32> to vector<8x32xf32>
    %c8_i32 = arith.constant 8 : i32
    %96 = arith.index_cast %c8_i32 : i32 to index
    %c0_57 = arith.constant 0 : index
    %c0_58 = arith.constant 0 : index
    %97 = vector.load %arg11[%96, %c0_57, %c0_58] : memref<12x8x48xf32, #tpu.memory_space<vmem>>, vector<1x8x48xf32>
    %98 = vector.shape_cast %97 : vector<1x8x48xf32> to vector<8x48xf32>
    %cst_59 = arith.constant dense<0.000000e+00> : vector<8x48xf32>
    %99 = tpu.matmul %95, %14, %cst_59 {dimension_numbers = #tpu.dot_dimension_numbers<[1], [0], [0], [1], [0, 0, 1, 1], [], []>} : vector<8x32xf32>, vector<32x48xf32>, vector<8x48xf32> -> vector<8x48xf32>
    %100 = arith.addf %98, %99 : vector<8x48xf32>
    %101 = arith.index_cast %c8_i32 : i32 to index
    %c0_60 = arith.constant 0 : index
    %c0_61 = arith.constant 0 : index
    %102 = vector.load %arg11[%101, %c0_60, %c0_61] : memref<12x8x48xf32, #tpu.memory_space<vmem>>, vector<1x8x48xf32>
    %103 = vector.shape_cast %102 : vector<1x8x48xf32> to vector<8x48xf32>
    %104 = vector.shape_cast %100 : vector<8x48xf32> to vector<1x8x48xf32>
    tpu.vector_store %arg11[%101, %c0_60, %c0_61], %104 {strides = array<i32>} : memref<12x8x48xf32, #tpu.memory_space<vmem>>, vector<1x8x48xf32>,
    %105 = vector.extract_strided_slice %100 {offsets = [0, 0], sizes = [8, 32], strides = [1, 1]} : vector<8x48xf32> to vector<8x32xf32>
    %c9_i32 = arith.constant 9 : i32
    %106 = arith.index_cast %c9_i32 : i32 to index
    %c0_62 = arith.constant 0 : index
    %c0_63 = arith.constant 0 : index
    %107 = vector.load %arg11[%106, %c0_62, %c0_63] : memref<12x8x48xf32, #tpu.memory_space<vmem>>, vector<1x8x48xf32>
    %108 = vector.shape_cast %107 : vector<1x8x48xf32> to vector<8x48xf32>
    %cst_64 = arith.constant dense<0.000000e+00> : vector<8x48xf32>
    %109 = tpu.matmul %105, %14, %cst_64 {dimension_numbers = #tpu.dot_dimension_numbers<[1], [0], [0], [1], [0, 0, 1, 1], [], []>} : vector<8x32xf32>, vector<32x48xf32>, vector<8x48xf32> -> vector<8x48xf32>
    %110 = arith.addf %108, %109 : vector<8x48xf32>
    %111 = arith.index_cast %c9_i32 : i32 to index
    %c0_65 = arith.constant 0 : index
    %c0_66 = arith.constant 0 : index
    %112 = vector.load %arg11[%111, %c0_65, %c0_66] : memref<12x8x48xf32, #tpu.memory_space<vmem>>, vector<1x8x48xf32>
    %113 = vector.shape_cast %112 : vector<1x8x48xf32> to vector<8x48xf32>
    %114 = vector.shape_cast %110 : vector<8x48xf32> to vector<1x8x48xf32>
    tpu.vector_store %arg11[%111, %c0_65, %c0_66], %114 {strides = array<i32>} : memref<12x8x48xf32, #tpu.memory_space<vmem>>, vector<1x8x48xf32>,
    %115 = vector.extract_strided_slice %110 {offsets = [0, 0], sizes = [8, 32], strides = [1, 1]} : vector<8x48xf32> to vector<8x32xf32>
    %c10_i32 = arith.constant 10 : i32
    %116 = arith.index_cast %c10_i32 : i32 to index
    %c0_67 = arith.constant 0 : index
    %c0_68 = arith.constant 0 : index
    %117 = vector.load %arg11[%116, %c0_67, %c0_68] : memref<12x8x48xf32, #tpu.memory_space<vmem>>, vector<1x8x48xf32>
    %118 = vector.shape_cast %117 : vector<1x8x48xf32> to vector<8x48xf32>
    %cst_69 = arith.constant dense<0.000000e+00> : vector<8x48xf32>
    %119 = tpu.matmul %115, %14, %cst_69 {dimension_numbers = #tpu.dot_dimension_numbers<[1], [0], [0], [1], [0, 0, 1, 1], [], []>} : vector<8x32xf32>, vector<32x48xf32>, vector<8x48xf32> -> vector<8x48xf32>
    %120 = arith.addf %118, %119 : vector<8x48xf32>
    %121 = arith.index_cast %c10_i32 : i32 to index
    %c0_70 = arith.constant 0 : index
    %c0_71 = arith.constant 0 : index
    %122 = vector.load %arg11[%121, %c0_70, %c0_71] : memref<12x8x48xf32, #tpu.memory_space<vmem>>, vector<1x8x48xf32>
    %123 = vector.shape_cast %122 : vector<1x8x48xf32> to vector<8x48xf32>
    %124 = vector.shape_cast %120 : vector<8x48xf32> to vector<1x8x48xf32>
    tpu.vector_store %arg11[%121, %c0_70, %c0_71], %124 {strides = array<i32>} : memref<12x8x48xf32, #tpu.memory_space<vmem>>, vector<1x8x48xf32>,
    %125 = vector.extract_strided_slice %120 {offsets = [0, 0], sizes = [8, 32], strides = [1, 1]} : vector<8x48xf32> to vector<8x32xf32>
    %c11_i32 = arith.constant 11 : i32
    %126 = arith.index_cast %c11_i32 : i32 to index
    %c0_72 = arith.constant 0 : index
    %c0_73 = arith.constant 0 : index
    %127 = vector.load %arg11[%126, %c0_72, %c0_73] : memref<12x8x48xf32, #tpu.memory_space<vmem>>, vector<1x8x48xf32>
    %128 = vector.shape_cast %127 : vector<1x8x48xf32> to vector<8x48xf32>
    %cst_74 = arith.constant dense<0.000000e+00> : vector<8x48xf32>
    %129 = tpu.matmul %125, %14, %cst_74 {dimension_numbers = #tpu.dot_dimension_numbers<[1], [0], [0], [1], [0, 0, 1, 1], [], []>} : vector<8x32xf32>, vector<32x48xf32>, vector<8x48xf32> -> vector<8x48xf32>
    %130 = arith.addf %128, %129 : vector<8x48xf32>
    %131 = arith.index_cast %c11_i32 : i32 to index
    %c0_75 = arith.constant 0 : index
    %c0_76 = arith.constant 0 : index
    %132 = vector.load %arg11[%131, %c0_75, %c0_76] : memref<12x8x48xf32, #tpu.memory_space<vmem>>, vector<1x8x48xf32>
    %133 = vector.shape_cast %132 : vector<1x8x48xf32> to vector<8x48xf32>
    %134 = vector.shape_cast %130 : vector<8x48xf32> to vector<1x8x48xf32>
    tpu.vector_store %arg11[%131, %c0_75, %c0_76], %134 {strides = array<i32>} : memref<12x8x48xf32, #tpu.memory_space<vmem>>, vector<1x8x48xf32>,
    %135 = vector.extract_strided_slice %130 {offsets = [0, 0], sizes = [8, 32], strides = [1, 1]} : vector<8x48xf32> to vector<8x32xf32>
    %c12_i32 = arith.constant 12 : i32
    %c0_77 = arith.constant 0 : index
    %c0_78 = arith.constant 0 : index
    %136 = vector.load %arg10[%c0_77, %c0_78] : memref<8x32xf32, #tpu.memory_space<vmem>>, vector<8x32xf32>
    tpu.vector_store %arg10[%c0_77, %c0_78], %135 {strides = array<i32>} : memref<8x32xf32, #tpu.memory_space<vmem>>, vector<8x32xf32>,
    %c0_79 = arith.constant 0 : index
    %c0_80 = arith.constant 0 : index
    %c0_81 = arith.constant 0 : index
    %137 = vector.load %arg11[%c0_79, %c0_80, %c0_81] : memref<12x8x48xf32, #tpu.memory_space<vmem>>, vector<12x8x48xf32>
    %138 = vector.shape_cast %137 : vector<12x8x48xf32> to vector<96x48xf32>
    %c0_82 = arith.constant 0 : index
    %c0_83 = arith.constant 0 : index
    %139 = vector.load %arg7[%c0_82, %c0_83] : memref<48x16xf32, #tpu.memory_space<vmem>>, vector<48x16xf32>
    %cst_84 = arith.constant dense<0.000000e+00> : vector<96x16xf32>
    %140 = tpu.matmul %138, %139, %cst_84 {dimension_numbers = #tpu.dot_dimension_numbers<[1], [0], [0], [1], [0, 0, 1, 1], [], []>} : vector<96x48xf32>, vector<48x16xf32>, vector<96x16xf32> -> vector<96x16xf32>
    %c0_85 = arith.constant 0 : index
    %c0_86 = arith.constant 0 : index
    %141 = vector.load %arg8[%c0_85, %c0_86] : memref<1x16xf32, #tpu.memory_space<vmem>>, vector<1x16xf32>
    %142 = vector.broadcast %141 : vector<1x16xf32> to vector<96x16xf32>
    %143 = arith.addf %140, %142 : vector<96x16xf32>
    %cst_87 = arith.constant dense<0xFF800000> : vector<96xf32>
    %144 = vector.multi_reduction <maximumf>, %143, %cst_87 [1] : vector<96x16xf32> to vector<96xf32>
    %145 = vector.shape_cast %144 : vector<96xf32> to vector<96x1xf32>
    %146 = vector.broadcast %145 : vector<96x1xf32> to vector<96x16xf32>
    %147 = arith.subf %143, %146 : vector<96x16xf32>
    %148 = math.exp %147 : vector<96x16xf32>
    %cst_88 = arith.constant dense<0.000000e+00> : vector<96xf32>
    %149 = vector.multi_reduction <add>, %148, %cst_88 [1] : vector<96x16xf32> to vector<96xf32>
    %150 = vector.shape_cast %149 : vector<96xf32> to vector<96x1xf32>
    %151 = math.log %150 : vector<96x1xf32>
    %152 = vector.broadcast %151 : vector<96x1xf32> to vector<96x16xf32>
    %153 = arith.subf %147, %152 : vector<96x16xf32>
    %154 = vector.shape_cast %153 : vector<96x16xf32> to vector<12x8x16xf32>
    %c0_89 = arith.constant 0 : index
    %c0_90 = arith.constant 0 : index
    %c0_91 = arith.constant 0 : index
    %155 = vector.load %arg9[%c0_89, %c0_90, %c0_91] : memref<12x8x16xf32, #tpu.memory_space<vmem>>, vector<12x8x16xf32>
    tpu.vector_store %arg9[%c0_89, %c0_90, %c0_91], %154 {strides = array<i32>} : memref<12x8x16xf32, #tpu.memory_space<vmem>>, vector<12x8x16xf32>,
    return
  }
}

</mosaic_0001>

<bundles_post_ra>
// kernel: tpu_custom_call.1
= control target key start
LH: loop header
LB: loop body
LE: loop exit
PB: predicated region body
PF: predicated region fallthrough
CT: control target
= control target key end

     0   :  { %16 = vsyncpa [#allocation4], 0  ;;  %vm42_vm0 = vcmask 64512   ;;  %vm80_vm1 = vcmask 130048   ;;  %vm201_vm2 = vcmask 261120   ;;  %s1370_s0 = inlined_call_operand.vmem [shape: f32[8,8], index: 0, kind: input, shape index: {}]   ;;  %s1371_s1 = inlined_call_operand.vmem [shape: f32[96,16], index: 1, kind: input, shape index: {}]   ;;  %s1372_s2 = inlined_call_operand.vmem [shape: f32[8,32], index: 2, kind: input, shape index: {}]   ;;  %s1373_s3 = inlined_call_operand.vmem [shape: f32[8,48], index: 3, kind: input, shape index: {}]   ;;  %s1374_s4 = inlined_call_operand.vmem [shape: f32[16,48], index: 4, kind: input, shape index: {}]   ;;  %s1375_s5 = inlined_call_operand.vmem [shape: f32[32,48], index: 5, kind: input, shape index: {}]   ;;  %s1376_s6 = inlined_call_operand.vmem [shape: f32[1,48], index: 6, kind: input, shape index: {}]   ;;  %s1377_s7 = inlined_call_operand.vmem [shape: f32[48,16], index: 7, kind: input, shape index: {}]   ;;  %s1378_s8 = inlined_call_operand.vmem [shape: f32[1,16], index: 8, kind: input, shape index: {}]   ;;  %s1379_s9 = inlined_call_operand.hbm [shape: f32[12,8,16], index: 9, kind: output, shape index: {0}]   ;;  %s1380_s10 = inlined_call_operand.hbm [shape: f32[8,32], index: 10, kind: output, shape index: {1}]  }
   0x1   :  { %v37_v0 = vld [vmem:[%s1373_s3] sm:$0xff]  ;;  %v79_v1 = vld [vmem:[%s1374_s4 + $0x8] sm:$0xff]  ;;  %v68_v4 = vld [vmem:[%s1371_s1 + $0x10] sm:$0xff] }
   0x2   :  { %v36_v2 = vld [vmem:[%s1370_s0] sm:$0xff]  ;;  %61 = vmatpush.msra.mxu0 %v37_v0  ;;  %863 = vmatpush.msra.mxu1 %v79_v1  ;;  %v1060_v5 = vld [vmem:[%s1375_s5 + $0x18] sm:$0xff]  ;;  %v1066_v6 = vld [vmem:[%s1375_s5 + $0x10] sm:$0xff] }
   0x3   :  { %v78_v3 = vld [vmem:[%s1374_s4] sm:$0xff]  ;;  %826 = vmatmul.msk.f32.vlgmr.msra.gmra.mxu0 %vm42_vm0, %v36_v2  ;;  %217 = vmatpush.msra.mxu2 %v1060_v5  ;;  %v1071_v7 = vld [vmem:[%s1375_s5 + $0x8] sm:$0xff] }
   0x4   :  { %131 = vmatpush.msrb.mxu0 %v79_v1  ;;  %864 = vmatpush.msra.mxu1 %v78_v3  ;;  %v1078_v8 = vld [vmem:[%s1375_s5] sm:$0xff] }
   0x5   :  { %829 = vmatmul.msk.f32.vlgmr.msra.gmra.mxu1 %vm80_vm1, %v68_v4  ;;  %218 = vmatpush.msra.mxu2 %v1066_v6  ;;  %v199_v9 = vld [vmem:[%s1372_s2] sm:$0xff] }
   0x6   :  { %132 = vmatpush.msrb.mxu0 %v78_v3  ;;  %244 = vmatpush.msra.mxu3 %v1060_v5 }
   0x7   :  { %219 = vmatpush.msra.mxu2 %v1071_v7 }
   0x8   :  { %271 = vmatpush.msra.mxu0 %v1060_v5 }
   0x9   :  { %17 = vsyncpa [#allocation6], 0  ;;  %v66_v10 = vld [vmem:[%s1371_s1] sm:$0xff]  ;;  %245 = vmatpush.msra.mxu3 %v1066_v6  ;;  %220 = vmatpush.msra.mxu2 %v1078_v8  ;;  %v69_v11 = vld [vmem:[%s1371_s1 + $0x18] sm:$0xff]  ;;  %vm182_vm3 = vcmask 392192   ;;  %s812_s21 = sshll.u32 %s1380_s10, 4  ;;  %s813_s21 = int_to_ptr.hbm [resolvable:$true] %s812_s21 }
   0xa   :  { %272 = vmatpush.msra.mxu0 %v1066_v6  ;;  %839 = vmatmul.msk.f32.vlgmr.msra.gmra.mxu2 %vm201_vm2, %v199_v9  ;;  %v67_v12 = vld [vmem:[%s1371_s1 + $0x8] sm:$0xff]  ;;  %v70_v13 = vld [vmem:[%s1371_s1 + $0x20] sm:$0xff]  ;;  %v72_v15 = vld [vmem:[%s1371_s1 + $0x30] sm:$0xff]  ;;  %s984_s10 = smov [#allocation3]   ;;  %s798_s0 = sshll.u32 %s1379_s9, 4  ;;  %s799_s0 = int_to_ptr.hbm [resolvable:$true] %s798_s0 }
   0xb   :  { %246 = vmatpush.msra.mxu3 %v1071_v7  ;;  %827 = vmatmul.msk.f32.vlgmr.msrb.gmra.mxu0 %vm80_vm1, %v66_v10  ;;  %v71_v14 = vld [vmem:[%s1371_s1 + $0x28] sm:$0xff]  ;;  %v73_v16 = vld [vmem:[%s1371_s1 + $0x38] sm:$0xff]  ;;  %v74_v17 = vld [vmem:[%s1371_s1 + $0x40] sm:$0xff]  ;;  %s796_s22 = sshll.u32 %s984_s10, 4  ;;  %s985_s24 = smov 128   ;;  %s797_s22 = int_to_ptr.vmem [resolvable:$true] %s796_s22 }
   0xc   :  { %298 = vmatpush.msrb.mxu2 %v1060_v5  ;;  %273 = vmatpush.msra.mxu0 %v1071_v7  ;;  %v75_v18 = vld [vmem:[%s1371_s1 + $0x48] sm:$0xff]  ;;  %v76_v19 = vld [vmem:[%s1371_s1 + $0x50] sm:$0xff]  ;;  %v77_v20 = vld [vmem:[%s1371_s1 + $0x58] sm:$0xff]  ;;  %s986_s4 = smov 8  }
   0xd   :  { %247 = vmatpush.msra.mxu3 %v1078_v8  ;;  %830 = vmatmul.msk.f32.gmra.mxu1 %vm80_vm1, %v69_v11  ;;  %v881_v21 = vld [vmem:[%s1376_s6] ss:$0 sm:$0xff]  ;;  %v540_v10 = vld [vmem:[%s1377_s7 + $0x18] sm:$0xff]  ;;  %v539_v11 = vld [vmem:[%s1377_s7 + $0x10] sm:$0xff] }
   0xe   :  { %299 = vmatpush.msrb.mxu2 %v1066_v6  ;;  %274 = vmatpush.msra.mxu0 %v1078_v8 }
   0xf   :  { %325 = vmatpush.msrb.mxu3 %v1060_v5 }
  0x10   :  { %300 = vmatpush.msrb.mxu2 %v1071_v7  ;;  %352 = vmatpush.msrb.mxu0 %v1060_v5 }
  0x11   :  { %326 = vmatpush.msrb.mxu3 %v1066_v6 }
  0x12   :  { %301 = vmatpush.msrb.mxu2 %v1078_v8  ;;  %353 = vmatpush.msrb.mxu0 %v1066_v6 }
  0x13   :  { %327 = vmatpush.msrb.mxu3 %v1071_v7  ;;  %828 = vmatmul.msk.f32.gmra.mxu0 %vm80_vm1, %v67_v12  ;;  %v538_v12 = vld [vmem:[%s1377_s7 + $0x8] sm:$0xff] }
  0x14   :  { %379 = vmatpush.msra.mxu2 %v1060_v5  ;;  %354 = vmatpush.msrb.mxu0 %v1071_v7 }
  0x15   :  { %328 = vmatpush.msrb.mxu3 %v1078_v8  ;;  %831 = vmatmul.msk.f32.gmra.mxu1 %vm80_vm1, %v70_v13  ;;  %v537_v13 = vld [vmem:[%s1377_s7] sm:$0xff] }
  0x16   :  { %380 = vmatpush.msra.mxu2 %v1066_v6  ;;  %355 = vmatpush.msrb.mxu0 %v1078_v8 }
  0x18   :  { %381 = vmatpush.msra.mxu2 %v1071_v7 }
  0x1a   :  { %382 = vmatpush.msra.mxu2 %v1078_v8 }
  0x1d   :  { %832 = vmatmul.msk.f32.gmra.mxu1 %vm80_vm1, %v71_v14 }
  0x25   :  { %833 = vmatmul.msk.f32.gmra.mxu1 %vm80_vm1, %v72_v15 }
  0x2d   :  { %834 = vmatmul.msk.f32.gmra.mxu1 %vm80_vm1, %v73_v16 }
  0x35   :  { %835 = vmatmul.msk.f32.gmra.mxu1 %vm80_vm1, %v74_v17 }
  0x3d   :  { %836 = vmatmul.msk.f32.gmra.mxu1 %vm80_vm1, %v75_v18 }
  0x45   :  { %837 = vmatmul.msk.f32.gmra.mxu1 %vm80_vm1, %v76_v19 }
  0x4d   :  { %838 = vmatmul.msk.f32.gmra.mxu1 %vm80_vm1, %v77_v20 }
  0x80   :  { %v63_v22 = vpop.f32.mrf.mxu0 }
  0x81   :  { %v64_v23 = vadd.f32 %v881_v21, %v63_v22 }
  0x82   :  { %v140_v24 = vpop.f32.mrf.mxu1 }
  0x83   :  { %v172_v25 = vadd.f32 %v140_v24, %v64_v23 }
  0x85   :  { %185 = vst.msk [vmem:[#allocation2 + $0x10] sm:$0xff] %vm182_vm3, %v172_v25  ;;  %v1235_v25 = vld [vmem:[%s1378_s8] ss:$0 sm:$0xff]  ;;  %s983_s8 = smov [#allocation5]  }
  0x86   :  { %s810_s18 = sshll.u32 %s983_s8, 4  ;;  %s811_s18 = int_to_ptr.vmem [resolvable:$true] %s810_s18 }
  0x88   :  { %v134_v26 = vpop.f32.mrf.mxu0 }
  0x89   :  { %v170_v27 = vadd.f32 %v134_v26, %v64_v23 }
  0x8a   :  { %v143_v28 = vpop.f32.mrf.mxu1 }
  0x8b   :  { %183 = vst.msk [vmem:[#allocation2] sm:$0xff] %vm182_vm3, %v170_v27  ;;  %v173_v29 = vadd.f32 %v143_v28, %v64_v23 }
  0x8c   :  { %v255_v54 = vld [vmem:[#allocation2 + $0x10] sm:$0xff] }
  0x8d   :  { %186 = vst.msk [vmem:[#allocation2 + $0x18] sm:$0xff] %vm182_vm3, %v173_v29  ;;  %v222_v31 = vpop.f32.mrf.mxu2 }
  0x90   :  { %v137_v30 = vpop.f32.mrf.mxu0 }
  0x91   :  { %v171_v32 = vadd.f32 %v137_v30, %v64_v23 }
  0x92   :  { %v146_v33 = vpop.f32.mrf.mxu1  ;;  %v200_v34 = vld [vmem:[#allocation2] sm:$0xff] }
  0x93   :  { %184 = vst.msk [vmem:[#allocation2 + $0x8] sm:$0xff] %vm182_vm3, %v171_v32  ;;  %v174_v35 = vadd.f32 %v146_v33, %v64_v23  ;;  %v225_v36 = vadd.f32 %v222_v31, %v200_v34 }
  0x94   :  { %v282_v57 = vld [vmem:[#allocation2 + $0x18] sm:$0xff] }
  0x95   :  { %187 = vst.msk [vmem:[#allocation2 + $0x20] sm:$0xff] %vm182_vm3, %v174_v35  ;;  %840 = vmatmul.msk.f32.vlgmr.msra.gmra.mxu3 %vm201_vm2, %v225_v36 }
  0x96   :  { %226 = vst.msk [vmem:[#allocation2] sm:$0xff] %vm182_vm3, %v225_v36  ;;  %406 = vmatpush.msra.mxu3 %v1060_v5 }
  0x98   :  { %407 = vmatpush.msra.mxu3 %v1066_v6 }
  0x9a   :  { %v149_v37 = vpop.f32.mrf.mxu1  ;;  %408 = vmatpush.msra.mxu3 %v1071_v7  ;;  %v228_v51 = vld [vmem:[#allocation2 + $0x8] sm:$0xff] }
  0x9b   :  { %v175_v38 = vadd.f32 %v149_v37, %v64_v23 }
  0x9c   :  { %409 = vmatpush.msra.mxu3 %v1078_v8  ;;  %v309_v60 = vld [vmem:[#allocation2 + $0x20] sm:$0xff] }
  0x9d   :  { %188 = vst.msk [vmem:[#allocation2 + $0x28] sm:$0xff] %vm182_vm3, %v175_v38 }
  0xa2   :  { %v152_v39 = vpop.f32.mrf.mxu1 }
  0xa3   :  { %v176_v40 = vadd.f32 %v152_v39, %v64_v23 }
  0xa4   :  { %v336_v63 = vld [vmem:[#allocation2 + $0x28] sm:$0xff] }
  0xa5   :  { %189 = vst.msk [vmem:[#allocation2 + $0x30] sm:$0xff] %vm182_vm3, %v176_v40 }
  0xaa   :  { %v155_v41 = vpop.f32.mrf.mxu1 }
  0xab   :  { %v177_v42 = vadd.f32 %v155_v41, %v64_v23 }
  0xac   :  { %v363_v2 = vld [vmem:[#allocation2 + $0x30] sm:$0xff] }
  0xad   :  { %190 = vst.msk [vmem:[#allocation2 + $0x38] sm:$0xff] %vm182_vm3, %v177_v42 }
  0xb2   :  { %v158_v43 = vpop.f32.mrf.mxu1 }
  0xb3   :  { %v178_v44 = vadd.f32 %v158_v43, %v64_v23 }
  0xb5   :  { %191 = vst.msk [vmem:[#allocation2 + $0x40] sm:$0xff] %vm182_vm3, %v178_v44 }
  0xba   :  { %v161_v45 = vpop.f32.mrf.mxu1 }
  0xbb   :  { %v179_v46 = vadd.f32 %v161_v45, %v64_v23 }
  0xbc   :  { %v417_v14 = vld [vmem:[#allocation2 + $0x40] sm:$0xff] }
  0xbd   :  { %192 = vst.msk [vmem:[#allocation2 + $0x48] sm:$0xff] %vm182_vm3, %v179_v46 }
  0xc2   :  { %v164_v47 = vpop.f32.mrf.mxu1 }
  0xc3   :  { %v180_v48 = vadd.f32 %v164_v47, %v64_v23 }
  0xc4   :  { %v444_v22 = vld [vmem:[#allocation2 + $0x48] sm:$0xff] }
  0xc5   :  { %193 = vst.msk [vmem:[#allocation2 + $0x50] sm:$0xff] %vm182_vm3, %v180_v48 }
  0xca   :  { %v167_v49 = vpop.f32.mrf.mxu1 }
  0xcb   :  { %v181_v50 = vadd.f32 %v167_v49, %v64_v23  ;;  %v525_v49 = vld [vmem:[#allocation2] sm:$0xff] }
  0xcc   :  { %v471_v44 = vld [vmem:[#allocation2 + $0x50] sm:$0xff] }
  0xcd   :  { %194 = vst.msk [vmem:[#allocation2 + $0x58] sm:$0xff] %vm182_vm3, %v181_v50 }
 0x118   :  { %v249_v52 = vpop.f32.mrf.mxu3 }
 0x119   :  { %v252_v53 = vadd.f32 %v249_v52, %v228_v51 }
 0x11b   :  { %253 = vst.msk [vmem:[#allocation2 + $0x8] sm:$0xff] %vm182_vm3, %v252_v53  ;;  %841 = vmatmul.msk.f32.vlgmr.msra.gmra.mxu0 %vm201_vm2, %v252_v53 }
 0x11c   :  { %433 = vmatpush.msra.mxu0 %v1060_v5 }
 0x11e   :  { %434 = vmatpush.msra.mxu0 %v1066_v6 }
 0x120   :  { %435 = vmatpush.msra.mxu0 %v1071_v7 }
 0x122   :  { %436 = vmatpush.msra.mxu0 %v1078_v8 }
 0x198   :  { %v276_v55 = vpop.f32.mrf.mxu0 }
 0x199   :  { %v279_v56 = vadd.f32 %v276_v55, %v255_v54  ;;  %v526_v54 = vld [vmem:[#allocation2 + $0x8] sm:$0xff] }
 0x19b   :  { %280 = vst.msk [vmem:[#allocation2 + $0x10] sm:$0xff] %vm182_vm3, %v279_v56  ;;  %842 = vmatmul.msk.f32.vlgmr.msrb.gmra.mxu2 %vm201_vm2, %v279_v56 }
 0x19c   :  { %460 = vmatpush.msrb.mxu2 %v1060_v5 }
 0x19e   :  { %461 = vmatpush.msrb.mxu2 %v1066_v6 }
 0x1a0   :  { %462 = vmatpush.msrb.mxu2 %v1071_v7 }
 0x1a2   :  { %463 = vmatpush.msrb.mxu2 %v1078_v8  ;;  %v527_v17 = vld [vmem:[#allocation2 + $0x10] sm:$0xff] }
 0x21e   :  { %v303_v58 = vpop.f32.mrf.mxu2 }
 0x21f   :  { %v306_v59 = vadd.f32 %v303_v58, %v282_v57  ;;  %v498_v57 = vld [vmem:[#allocation2 + $0x58] sm:$0xff] }
 0x221   :  { %307 = vst.msk [vmem:[#allocation2 + $0x18] sm:$0xff] %vm182_vm3, %v306_v59  ;;  %843 = vmatmul.msk.f32.vlgmr.msrb.gmra.mxu3 %vm201_vm2, %v306_v59 }
 0x222   :  { %487 = vmatpush.msrb.mxu3 %v1060_v5 }
 0x224   :  { %488 = vmatpush.msrb.mxu3 %v1066_v6 }
 0x226   :  { %489 = vmatpush.msrb.mxu3 %v1071_v7 }
 0x228   :  { %490 = vmatpush.msrb.mxu3 %v1078_v8  ;;  %v528_v18 = vld [vmem:[#allocation2 + $0x18] sm:$0xff] }
 0x2a4   :  { %v330_v61 = vpop.f32.mrf.mxu3 }
 0x2a5   :  { %v333_v62 = vadd.f32 %v330_v61, %v309_v60 }
 0x2a7   :  { %334 = vst.msk [vmem:[#allocation2 + $0x20] sm:$0xff] %vm182_vm3, %v333_v62  ;;  %844 = vmatmul.msk.f32.vlgmr.msrb.gmra.mxu0 %vm201_vm2, %v333_v62 }
 0x2a8   :  { %514 = vmatpush.msrb.mxu0 %v1060_v5  ;;  %v390_v5 = vld [vmem:[#allocation2 + $0x38] sm:$0xff] }
 0x2aa   :  { %515 = vmatpush.msrb.mxu0 %v1066_v6 }
 0x2ac   :  { %516 = vmatpush.msrb.mxu0 %v1071_v7  ;;  %v542_v7 = vld [vmem:[%s1377_s7 + $0x28] sm:$0xff] }
 0x2ae   :  { %517 = vmatpush.msrb.mxu0 %v1078_v8  ;;  %v541_v8 = vld [vmem:[%s1377_s7 + $0x20] sm:$0xff] }
 0x2af   :  { %v529_v19 = vld [vmem:[#allocation2 + $0x20] sm:$0xff] }
 0x324   :  { %v357_v0 = vpop.f32.mrf.mxu0 }
 0x325   :  { %v360_v1 = vadd.f32 %v357_v0, %v336_v63 }
 0x327   :  { %361 = vst.msk [vmem:[#allocation2 + $0x28] sm:$0xff] %vm182_vm3, %v360_v1  ;;  %845 = vmatmul.msk.f32.vlgmr.msra.gmra.mxu2 %vm201_vm2, %v360_v1 }
 0x328   :  { %865 = vmatpush.msra.mxu2 %v542_v7 }
 0x32a   :  { %867 = vmatpush.msra.mxu2 %v541_v8 }
 0x32c   :  { %869 = vmatpush.msra.mxu2 %v540_v10 }
 0x32e   :  { %871 = vmatpush.msra.mxu2 %v539_v11  ;;  %v530_v20 = vld [vmem:[#allocation2 + $0x28] sm:$0xff] }
 0x330   :  { %873 = vmatpush.msra.mxu2 %v538_v12 }
 0x332   :  { %875 = vmatpush.msra.mxu2 %v537_v13 }
 0x3aa   :  { %v384_v3 = vpop.f32.mrf.mxu2 }
 0x3ab   :  { %v387_v4 = vadd.f32 %v384_v3, %v363_v2 }
 0x3ad   :  { %388 = vst.msk [vmem:[#allocation2 + $0x30] sm:$0xff] %vm182_vm3, %v387_v4  ;;  %846 = vmatmul.msk.f32.vlgmr.msra.gmra.mxu3 %vm201_vm2, %v387_v4 }
 0x3ae   :  { %866 = vmatpush.msra.mxu3 %v542_v7 }
 0x3b0   :  { %868 = vmatpush.msra.mxu3 %v541_v8 }
 0x3b2   :  { %870 = vmatpush.msra.mxu3 %v540_v10 }
 0x3b4   :  { %872 = vmatpush.msra.mxu3 %v539_v11  ;;  %v531_v21 = vld [vmem:[#allocation2 + $0x30] sm:$0xff] }
 0x3b6   :  { %874 = vmatpush.msra.mxu3 %v538_v12 }
 0x3b8   :  { %876 = vmatpush.msra.mxu3 %v537_v13 }
 0x430   :  { %v411_v6 = vpop.f32.mrf.mxu3 }
 0x431   :  { %v414_v9 = vadd.f32 %v411_v6, %v390_v5 }
 0x433   :  { %415 = vst.msk [vmem:[#allocation2 + $0x38] sm:$0xff] %vm182_vm3, %v414_v9  ;;  %847 = vmatmul.msk.f32.vlgmr.msra.gmra.mxu0 %vm201_vm2, %v414_v9 }
 0x434   :  { %593 = vmatpush.msra.mxu0 %v542_v7 }
 0x436   :  { %594 = vmatpush.msra.mxu0 %v541_v8 }
 0x438   :  { %595 = vmatpush.msra.mxu0 %v540_v10 }
 0x43a   :  { %596 = vmatpush.msra.mxu0 %v539_v11  ;;  %v532_v28 = vld [vmem:[#allocation2 + $0x38] sm:$0xff] }
 0x43c   :  { %597 = vmatpush.msra.mxu0 %v538_v12 }
 0x43e   :  { %598 = vmatpush.msra.mxu0 %v537_v13 }
 0x4b0   :  { %v438_v15 = vpop.f32.mrf.mxu0 }
 0x4b1   :  { %v441_v16 = vadd.f32 %v438_v15, %v417_v14 }
 0x4b3   :  { %442 = vst.msk [vmem:[#allocation2 + $0x40] sm:$0xff] %vm182_vm3, %v441_v16  ;;  %848 = vmatmul.msk.f32.vlgmr.msrb.gmra.mxu2 %vm201_vm2, %v441_v16 }
 0x4ba   :  { %v533_v32 = vld [vmem:[#allocation2 + $0x40] sm:$0xff] }
 0x4bb   :  { %853 = vmatmul.msk.f32.vlgmr.msra.gmra.mxu2 %vm182_vm3, %v527_v17 }
 0x4c3   :  { %854 = vmatmul.msk.f32.gmra.mxu2 %vm182_vm3, %v528_v18 }
 0x4cb   :  { %855 = vmatmul.msk.f32.gmra.mxu2 %vm182_vm3, %v529_v19 }
 0x4d3   :  { %856 = vmatmul.msk.f32.gmra.mxu2 %vm182_vm3, %v530_v20 }
 0x4db   :  { %857 = vmatmul.msk.f32.gmra.mxu2 %vm182_vm3, %v531_v21 }
 0x536   :  { %v465_v23 = vpop.f32.mrf.mxu2 }
 0x537   :  { %v468_v24 = vadd.f32 %v465_v23, %v444_v22 }
 0x539   :  { %469 = vst.msk [vmem:[#allocation2 + $0x48] sm:$0xff] %vm182_vm3, %v468_v24  ;;  %849 = vmatmul.msk.f32.vlgmr.msrb.gmra.mxu3 %vm201_vm2, %v468_v24 }
 0x53e   :  { %v606_v26 = vpop.f32.mrf.mxu2 }
 0x53f   :  { %v1238_v27 = vadd.f32 %v1235_v25, %v606_v26 }
 0x540   :  { %v534_v36 = vld [vmem:[#allocation2 + $0x48] sm:$0xff] }
 0x541   :  { %858 = vmatmul.msk.f32.vlgmr.msra.gmra.mxu3 %vm182_vm3, %v532_v28  ;;  %v642_v29 = vsel %vm80_vm1, %v1238_v27, -inf }
 0x542   :  { %643 = vmax.xlane.f32.xlu1 %v642_v29 }
 0x546   :  { %v609_v30 = vpop.f32.mrf.mxu2 }
 0x547   :  { %v1244_v31 = vadd.f32 %v1235_v25, %v609_v30 }
 0x549   :  { %859 = vmatmul.msk.f32.gmra.mxu3 %vm182_vm3, %v533_v32  ;;  %v645_v33 = vsel %vm80_vm1, %v1244_v31, -inf }
 0x54a   :  { %646 = vmax.xlane.f32.xlu1 %v645_v33 }
 0x54e   :  { %v612_v34 = vpop.f32.mrf.mxu2 }
 0x54f   :  { %v613_v35 = vadd.f32 %v1235_v25, %v612_v34 }
 0x551   :  { %860 = vmatmul.msk.f32.gmra.mxu3 %vm182_vm3, %v534_v36  ;;  %v648_v37 = vsel %vm80_vm1, %v613_v35, -inf }
 0x552   :  { %649 = vmax.xlane.f32.xlu2 %v648_v37 }
 0x556   :  { %v615_v38 = vpop.f32.mrf.mxu2 }
 0x557   :  { %v1253_v39 = vadd.f32 %v1235_v25, %v615_v38 }
 0x559   :  { %v651_v40 = vsel %vm80_vm1, %v1253_v39, -inf }
 0x55a   :  { %652 = vmax.xlane.f32.xlu2 %v651_v40 }
 0x55e   :  { %v618_v41 = vpop.f32.mrf.mxu2 }
 0x55f   :  { %v1258_v42 = vadd.f32 %v1235_v25, %v618_v41 }
 0x561   :  { %v654_v43 = vsel %vm80_vm1, %v1258_v42, -inf }
 0x562   :  { %655 = vmax.xlane.f32.xlu0 %v654_v43 }
 0x5b5   :  { %v644_v56 = vpop.xlane.xlu1 %643 }
 0x5b6   :  { %v1301_v30 = vsub.f32 %v1238_v27, %v644_v56 }
 0x5b8   :  { %v688_v37 = vmul.f32 1.442695, %v1301_v30 }
 0x5bc   :  { %v492_v45 = vpop.f32.mrf.mxu3 }
 0x5bd   :  { %v495_v46 = vadd.f32 %v492_v45, %v471_v44  ;;  %v647_v60 = vpop.xlane.xlu1 %646 }
 0x5be   :  { %v1296_v23 = vsub.f32 %v1244_v31, %v647_v60 }
 0x5bf   :  { %496 = vst.msk [vmem:[#allocation2 + $0x50] sm:$0xff] %vm182_vm3, %v495_v46  ;;  %850 = vmatmul.msk.f32.vlgmr.msrb.gmra.mxu0 %vm201_vm2, %v495_v46 }
 0x5c0   :  { %v690_v28 = vmul.f32 1.442695, %v1296_v23 }
 0x5c4   :  { %v621_v47 = vpop.f32.mrf.mxu3 }
 0x5c5   :  { %v622_v48 = vadd.f32 %v1235_v25, %v621_v47  ;;  %v650_v61 = vpop.xlane.xlu2 %649 }
 0x5c6   :  { %v535_v50 = vld [vmem:[#allocation2 + $0x50] sm:$0xff]  ;;  %v1276_v63 = vsub.f32 %v613_v35, %v650_v61 }
 0x5c7   :  { %851 = vmatmul.msk.f32.vlgmr.msra.gmra.mxu0 %vm182_vm3, %v525_v49  ;;  %861 = vmatmul.msk.f32.gmra.mxu3 %vm182_vm3, %v535_v50  ;;  %v657_v51 = vsel %vm80_vm1, %v622_v48, -inf }
 0x5c8   :  { %658 = vmax.xlane.f32.xlu1 %v657_v51  ;;  %v692_v4 = vmul.f32 1.442695, %v1276_v63 }
 0x5ca   :  { %883 = vpow2.f32 %v692_v4 }
 0x5cc   :  { %v624_v52 = vpop.f32.mrf.mxu3 }
 0x5cd   :  { %v1269_v53 = vadd.f32 %v1235_v25, %v624_v52  ;;  %v653_v38 = vpop.xlane.xlu2 %652 }
 0x5ce   :  { %v1317_v46 = vsub.f32 %v1253_v39, %v653_v38 }
 0x5cf   :  { %852 = vmatmul.msk.f32.gmra.mxu0 %vm182_vm3, %v526_v54  ;;  %v660_v55 = vsel %vm80_vm1, %v1269_v53, -inf }
 0x5d0   :  { %661 = vmax.xlane.f32.xlu2 %v660_v55  ;;  %v884_v14 = vpop.eup %883 }
 0x5d1   :  { %v720_v16 = vsel %vm80_vm1, %v884_v14, 0.0 }
 0x5d4   :  { %v627_v62 = vpop.f32.mrf.mxu3 }
 0x5d5   :  { %v628_v15 = vadd.f32 %v1235_v25, %v627_v62  ;;  %v656_v20 = vpop.xlane.xlu0 %655 }
 0x5d6   :  { %v1306_v33 = vsub.f32 %v1258_v42, %v656_v20 }
 0x5d7   :  { %v663_v17 = vsel %vm80_vm1, %v628_v15, -inf }
 0x5d8   :  { %v696_v27 = vmul.f32 1.442695, %v1306_v33 }
 0x63b   :  { %v659_v5 = vpop.xlane.xlu1 %658 }
 0x63c   :  { %v519_v58 = vpop.f32.mrf.mxu0  ;;  %v1283_v7 = vsub.f32 %v622_v48, %v659_v5 }
 0x63d   :  { %v522_v59 = vadd.f32 %v519_v58, %v498_v57 }
 0x63e   :  { %v698_v13 = vmul.f32 1.442695, %v1283_v7 }
 0x63f   :  { %523 = vst.msk [vmem:[#allocation2 + $0x58] sm:$0xff] %vm182_vm3, %v522_v59 }
 0x640   :  { %524 = vst.msk [vmem:[#allocation5] sm:$0xff] %vm201_vm2, %v522_v59  ;;  %885 = vpow2.f32 %v698_v13 }
 0x641   :  { %815 = dma.vmem_to_hbm [thread:$0]  %s811_s18, 128, %s813_s21, [#allocation6]  }
 0x643   :  { %v662_v54 = vpop.xlane.xlu2 %661 }
 0x644   :  { %v600_v0 = vpop.f32.mrf.mxu0  ;;  %v1328_v61 = vsub.f32 %v1269_v53, %v662_v54 }
 0x645   :  { %v601_v1 = vadd.f32 %v1235_v25, %v600_v0 }
 0x646   :  { %v536_v2 = vld [vmem:[#allocation2 + $0x58] sm:$0xff]  ;;  %v886_v18 = vpop.eup %885 }
 0x647   :  { %862 = vmatmul.msk.f32.gmra.mxu3 %vm182_vm3, %v536_v2  ;;  %v636_v3 = vsel %vm80_vm1, %v601_v1, -inf  ;;  %v729_v19 = vsel %vm80_vm1, %v886_v18, 0.0 }
 0x648   :  { %637 = vmax.xlane.f32.xlu0 %v636_v3  ;;  %v700_v3 = vmul.f32 1.442695, %v1328_v61 }
 0x64a   :  { %v630_v6 = vpop.f32.mrf.mxu3 }
 0x64b   :  { %v631_v9 = vadd.f32 %v1235_v25, %v630_v6 }
 0x64c   :  { %v603_v8 = vpop.f32.mrf.mxu0 }
 0x64d   :  { %v604_v10 = vadd.f32 %v1235_v25, %v603_v8  ;;  %v666_v11 = vsel %vm80_vm1, %v631_v9, -inf }
 0x64e   :  { %667 = vmax.xlane.f32.xlu1 %v666_v11 }
 0x64f   :  { %v639_v12 = vsel %vm80_vm1, %v604_v10, -inf }
 0x650   :  { %640 = vmax.xlane.f32.xlu0 %v639_v12 }
 0x656   :  { %721 = vadd.xlane.f32.xlu1 %v720_v16 }
 0x658   :  { %664 = vmax.xlane.f32.xlu0 %v663_v17 }
 0x65e   :  { %730 = vadd.xlane.f32.xlu1 %v729_v19 }
 0x6bb   :  { %v638_v21 = vpop.xlane.xlu0 %637 }
 0x6bc   :  { %v1293_v22 = vsub.f32 %v601_v1, %v638_v21 }
 0x6be   :  { %v684_v24 = vmul.f32 1.442695, %v1293_v22 }
 0x6c0   :  { %887 = vpow2.f32 %v684_v24 }
 0x6c1   :  { %v668_v26 = vpop.xlane.xlu1 %667  ;;  %889 = vpow2.f32 %v690_v28 }
 0x6c2   :  { %v1308_v35 = vsub.f32 %v631_v9, %v668_v26 }
 0x6c3   :  { %v641_v29 = vpop.xlane.xlu0 %640 }
 0x6c4   :  { %v1303_v32 = vsub.f32 %v604_v10, %v641_v29  ;;  %v704_v41 = vmul.f32 1.442695, %v1308_v35 }
 0x6c6   :  { %v888_v34 = vpop.eup %887  ;;  %v686_v31 = vmul.f32 1.442695, %v1303_v32 }
 0x6c7   :  { %v708_v36 = vsel %vm80_vm1, %v888_v34, 0.0  ;;  %v890_v45 = vpop.eup %889 }
 0x6c8   :  { %891 = vpow2.f32 %v686_v31  ;;  %709 = vadd.xlane.f32.xlu0 %v708_v36  ;;  %v717_v50 = vsel %vm80_vm1, %v890_v45, 0.0 }
 0x6c9   :  { %v722_v40 = vpop.xlane.xlu1 %721 }
 0x6ca   :  { %893 = vlog2.f32 %v722_v40  ;;  %v633_v42 = vpop.f32.mrf.mxu3 }
 0x6cb   :  { %v634_v43 = vadd.f32 %v1235_v25, %v633_v42  ;;  %v665_v44 = vpop.xlane.xlu0 %664  ;;  %895 = vpow2.f32 %v688_v37  ;;  %v694_v25 = vmul.f32 1.442695, %v1317_v46 }
 0x6cc   :  { %897 = vpow2.f32 %v696_v27  ;;  %v1320_v49 = vsub.f32 %v628_v15, %v665_v44 }
 0x6cd   :  { %v669_v47 = vsel %vm80_vm1, %v634_v43, -inf  ;;  %899 = vpow2.f32 %v704_v41 }
 0x6ce   :  { %v892_v48 = vpop.eup %891  ;;  %670 = vmax.xlane.f32.xlu2 %v669_v47  ;;  %v702_v57 = vmul.f32 1.442695, %v1320_v49 }
 0x6cf   :  { %v711_v51 = vsel %vm80_vm1, %v892_v48, 0.0 }
 0x6d0   :  { %v894_v52 = vpop.eup %893  ;;  %718 = vadd.xlane.f32.xlu0 %v717_v50  ;;  %712 = vadd.xlane.f32.xlu1 %v711_v51 }
 0x6d1   :  { %v753_v39 = vmul.f32 0.6931472, %v894_v52  ;;  %v731_v55 = vpop.xlane.xlu1 %730  ;;  %v896_v56 = vpop.eup %895 }
 0x6d2   :  { %901 = vlog2.f32 %v731_v55  ;;  %v898_v58 = vpop.eup %897  ;;  %v714_v62 = vsel %vm80_vm1, %v896_v56, 0.0 }
 0x6d3   :  { %v772_v59 = vsub.f32 %v1276_v63, %v753_v39  ;;  %v900_v60 = vpop.eup %899  ;;  %903 = vpow2.f32 %v694_v25  ;;  %v726_v0 = vsel %vm80_vm1, %v898_v58, 0.0 }
 0x6d4   :  { %905 = vpow2.f32 %v702_v57  ;;  %v738_v1 = vsel %vm80_vm1, %v900_v60, 0.0 }
 0x6d5   :  { %784 = vst.msk [vmem:[#allocation3 + $0x20] sm:$0xff] %vm80_vm1, %v772_v59  ;;  %907 = vpow2.f32 %v700_v3 }
 0x6d6   :  { %715 = vadd.xlane.f32.xlu2 %v714_v62 }
 0x6d8   :  { %v902_v2 = vpop.eup %901  ;;  %727 = vadd.xlane.f32.xlu0 %v726_v0  ;;  %739 = vadd.xlane.f32.xlu1 %v738_v1 }
 0x6d9   :  { %v759_v63 = vmul.f32 0.6931472, %v902_v2  ;;  %v904_v4 = vpop.eup %903 }
 0x6da   :  { %v906_v5 = vpop.eup %905  ;;  %v723_v6 = vsel %vm80_vm1, %v904_v4, 0.0 }
 0x6db   :  { %v775_v53 = vsub.f32 %v1283_v7, %v759_v63  ;;  %v735_v9 = vsel %vm80_vm1, %v906_v5, 0.0  ;;  %v908_v8 = vpop.eup %907 }
 0x6dc   :  { %v732_v10 = vsel %vm80_vm1, %v908_v8, 0.0 }
 0x6dd   :  { %787 = vst.msk [vmem:[#allocation3 + $0x38] sm:$0xff] %vm80_vm1, %v775_v53 }
 0x6de   :  { %724 = vadd.xlane.f32.xlu2 %v723_v6 }
 0x6e0   :  { %736 = vadd.xlane.f32.xlu0 %v735_v9 }
 0x6e6   :  { %733 = vadd.xlane.f32.xlu2 %v732_v10 }
 0x73b   :  { %v710_v11 = vpop.xlane.xlu0 %709 }
 0x73c   :  { %909 = vlog2.f32 %v710_v11 }
 0x741   :  { %v671_v12 = vpop.xlane.xlu2 %670 }
 0x742   :  { %v910_v13 = vpop.eup %909  ;;  %v1340_v14 = vsub.f32 %v634_v43, %v671_v12 }
 0x743   :  { %v745_v7 = vmul.f32 0.6931472, %v910_v13  ;;  %v713_v15 = vpop.xlane.xlu1 %712  ;;  %v719_v16 = vpop.xlane.xlu0 %718 }
 0x744   :  { %v706_v17 = vmul.f32 1.442695, %v1340_v14  ;;  %911 = vlog2.f32 %v713_v15 }
 0x745   :  { %v768_v18 = vsub.f32 %v1293_v22, %v745_v7  ;;  %913 = vlog2.f32 %v719_v16 }
 0x746   :  { %915 = vpow2.f32 %v706_v17 }
 0x747   :  { %780 = vst.msk [vmem:[#allocation3] sm:$0xff] %vm80_vm1, %v768_v18 }
 0x749   :  { %v716_v19 = vpop.xlane.xlu2 %715 }
 0x74a   :  { %v912_v20 = vpop.eup %911  ;;  %917 = vlog2.f32 %v716_v19 }
 0x74b   :  { %v914_v21 = vpop.eup %913  ;;  %v747_v24 = vmul.f32 0.6931472, %v912_v20  ;;  %v740_v26 = vpop.xlane.xlu1 %739 }
 0x74c   :  { %v728_v28 = vpop.xlane.xlu0 %727  ;;  %v916_v29 = vpop.eup %915  ;;  %v751_v34 = vmul.f32 0.6931472, %v914_v21  ;;  %919 = vlog2.f32 %v740_v26 }
 0x74d   :  { %v769_v31 = vsub.f32 %v1303_v32, %v747_v24  ;;  %921 = vlog2.f32 %v728_v28  ;;  %v741_v36 = vsel %vm80_vm1, %v916_v29, 0.0 }
 0x74e   :  { %v771_v22 = vsub.f32 %v1296_v23, %v751_v34  ;;  %742 = vadd.xlane.f32.xlu2 %v741_v36 }
 0x74f   :  { %781 = vst.msk [vmem:[#allocation3 + $0x8] sm:$0xff] %vm80_vm1, %v769_v31 }
 0x750   :  { %v918_v37 = vpop.eup %917  ;;  %783 = vst.msk [vmem:[#allocation3 + $0x18] sm:$0xff] %vm80_vm1, %v771_v22 }
 0x751   :  { %v749_v38 = vmul.f32 0.6931472, %v918_v37  ;;  %v725_v27 = vpop.xlane.xlu2 %724 }
 0x752   :  { %v920_v32 = vpop.eup %919  ;;  %923 = vlog2.f32 %v725_v27 }
 0x753   :  { %v922_v23 = vpop.eup %921  ;;  %v770_v40 = vsub.f32 %v1301_v30, %v749_v38  ;;  %v765_v41 = vmul.f32 0.6931472, %v920_v32 }
 0x754   :  { %v737_v42 = vpop.xlane.xlu0 %736  ;;  %v757_v43 = vmul.f32 0.6931472, %v922_v23 }
 0x755   :  { %925 = vlog2.f32 %v737_v42  ;;  %782 = vst.msk [vmem:[#allocation3 + $0x10] sm:$0xff] %vm80_vm1, %v770_v40  ;;  %v778_v44 = vsub.f32 %v1308_v35, %v765_v41 }
 0x756   :  { %v774_v45 = vsub.f32 %v1306_v33, %v757_v43 }
 0x757   :  { %790 = vst.msk [vmem:[#allocation3 + $0x50] sm:$0xff] %vm80_vm1, %v778_v44 }
 0x758   :  { %v924_v47 = vpop.eup %923  ;;  %786 = vst.msk [vmem:[#allocation3 + $0x30] sm:$0xff] %vm80_vm1, %v774_v45 }
 0x759   :  { %v755_v48 = vmul.f32 0.6931472, %v924_v47  ;;  %v734_v50 = vpop.xlane.xlu2 %733 }
 0x75a   :  { %927 = vlog2.f32 %v734_v50 }
 0x75b   :  { %v926_v51 = vpop.eup %925  ;;  %v773_v30 = vsub.f32 %v1317_v46, %v755_v48 }
 0x75c   :  { %v763_v52 = vmul.f32 0.6931472, %v926_v51 }
 0x75d   :  { %785 = vst.msk [vmem:[#allocation3 + $0x28] sm:$0xff] %vm80_vm1, %v773_v30 }
 0x75e   :  { %v777_v25 = vsub.f32 %v1320_v49, %v763_v52 }
 0x760   :  { %789 = vst.msk [vmem:[#allocation3 + $0x48] sm:$0xff] %vm80_vm1, %v777_v25  ;;  %v928_v35 = vpop.eup %927 }
 0x761   :  { %v761_v33 = vmul.f32 0.6931472, %v928_v35 }
 0x763   :  { %v776_v54 = vsub.f32 %v1328_v61, %v761_v33 }
 0x765   :  { %788 = vst.msk [vmem:[#allocation3 + $0x40] sm:$0xff] %vm80_vm1, %v776_v54 }
 0x7c1   :  { %v743_v39 = vpop.xlane.xlu2 %742 }
 0x7c2   :  { %929 = vlog2.f32 %v743_v39 }
 0x7c8   :  { %v930_v46 = vpop.eup %929 }
 0x7c9   :  { %v767_v55 = vmul.f32 0.6931472, %v930_v46 }
 0x7cb   :  { %v779_v49 = vsub.f32 %v1340_v14, %v767_v55 }
 0x7cd   :  { %791 = vst.msk [vmem:[#allocation3 + $0x58] sm:$0xff] %vm80_vm1, %v779_v49 }
 0x7ce   :  { %804 = dma.vmem_to_hbm [thread:$0]  %s797_s22, 1536, %s799_s0, [#allocation4], %s985_s24, %s985_s24, %s986_s4  }
 0x7cf   :  { %979 = dma.done.wait [#allocation4], 1536  }
 0x7d0   :  { %980 = vsyncadd [#allocation4], 4294965760 }
 0x7d1   :  { %981 = dma.done.wait [#allocation6], 128  }
 0x7d2   :  { %982 = vsyncadd [#allocation6], 4294967168 }
 0x7d3   :  { %824 = vsyncpa [#allocation4], 1 }
 0x7d4   :  { %825 = vsyncpa [#allocation6], 1 }

</bundles_post_ra>
